<compile_context>
chip_gen: v7x
topology: tpu7x:2x2x1
jax: 0.10.0
libtpu: 0.0.40
codegen_flags: <defaults>
</compile_context>

<pallas_src>
import jax
import jax.numpy as jnp
from jax.experimental import pallas as pl
from jax.experimental.pallas import tpu as pltpu

_LANE_CANDIDATES = (1024, 512, 256, 128)   # lane-dense last dims (multiples of 128)
_TARGET_BLOCK_BYTES = 8 * 1024 * 1024      # ~8 MiB blocks amortize per-step overhead
_SINGLE_BLOCK_BYTES = 256 * 1024           # below this, a single block is fine
_VMEM_LIMIT_BYTES = 48 * 1024 * 1024       # 2 bufs x {in,out} x 8 MiB = 32 MiB + slack


def _linreg_kernel(w_ref, b_ref, x_ref, o_ref):
    # w_ref / b_ref: (1,) scalars in SMEM; x_ref / o_ref: (tm, lane) VMEM tiles.
    o_ref[...] = w_ref[0] * x_ref[...] + b_ref[0]


def _round_up(n: int, m: int) -> int:
    return ((n + m - 1) // m) * m


def _cdiv(a: int, b: int) -> int:
    return (a + b - 1) // b


def _choose_tiling(rows: int, lane: int):
    """Pick rows-per-block (multiple of 8, or full extent) and the grid length."""
    row_bytes = lane * 4
    total_bytes = rows * row_bytes
    if total_bytes <= _SINGLE_BLOCK_BYTES or rows <= 8:
        return rows, 1  # single full-extent block (allowed by the (8,128) rule)

    tm = min(rows, max(8, _TARGET_BLOCK_BYTES // row_bytes))
    tm = max(8, (tm // 8) * 8)
    n_blocks = _cdiv(rows, tm)

    # Guarantee >= 4 row-blocks so the pipeline overlaps DMA-in/compute/DMA-out.
    if n_blocks < 4:
        tm = max(8, _round_up(_cdiv(rows, 4), 8))
        n_blocks = _cdiv(rows, tm)

    # Prefer an even grid so v7x's two TensorCores both get work.
    if n_blocks % 2 == 1 and n_blocks > 1:
        tm_even = max(8, _round_up(_cdiv(rows, n_blocks + 1), 8))
        if _cdiv(rows, tm_even) % 2 == 0:
            tm = tm_even
            n_blocks = _cdiv(rows, tm)

    return tm, n_blocks


def linear_regression_forward(x: jax.Array, w: jax.Array, b: jax.Array) -> jax.Array:
    """Computes w * x + b on TPU via a tiled, lane-dense Pallas kernel.

    x: arbitrary-shaped float32 tensor (elementwise, matching the PyTorch module)
    w, b: (1,) float32 scalars (as in nn.Parameter(torch.randn(1)))
    """
    assert w.shape == (1,) and b.shape == (1,)
    orig_shape = x.shape
    flat = x.reshape(-1)
    total = flat.shape[0]

    # Widest lane-dense last dim that divides `total` exactly -> reshape is free,
    # no extra HBM passes for pad/slice.
    lane = None
    for cand in _LANE_CANDIDATES:
        if total % cand == 0:
            lane = cand
            break

    needs_pad = lane is None
    if needs_pad:
        # Fallback: total is not a multiple of 128 -> pad to the next multiple.
        padded = _round_up(max(total, 1), 128)
        lane = 128
        for cand in _LANE_CANDIDATES:
            if padded % cand == 0:
                lane = cand
                break
        flat = jnp.pad(flat, (0, padded - total))
    else:
        padded = total

    rows = padded // lane
    x2 = flat.reshape(rows, lane)
    tm, n_blocks = _choose_tiling(rows, lane)

    out = pl.pallas_call(
        _linreg_kernel,
        out_shape=jax.ShapeDtypeStruct((rows, lane), x.dtype),
        grid=(n_blocks,),
        in_specs=[
            pl.BlockSpec(memory_space=pltpu.MemorySpace.SMEM),   # w (scalar)
            pl.BlockSpec(memory_space=pltpu.MemorySpace.SMEM),   # b (scalar)
            pl.BlockSpec((tm, lane), lambda i: (i, 0)),          # x tile
        ],
        out_specs=pl.BlockSpec((tm, lane), lambda i: (i, 0)),
        compiler_params=pltpu.CompilerParams(
            dimension_semantics=("parallel",),
            vmem_limit_bytes=_VMEM_LIMIT_BYTES,
        ),
    )(w, b, x2)

    if needs_pad:
        return out.reshape(-1)[:total].reshape(orig_shape)
    return out.reshape(orig_shape)


if __name__ == "__main__":
    key = jax.random.PRNGKey(0)
    k_w, k_b, k_x1, k_x2, k_x3 = jax.random.split(key, 5)

    # Parameters, matching nn.Parameter(torch.randn(1)).
    w = jax.random.normal(k_w, (1,), dtype=jnp.float32)
    b = jax.random.normal(k_b, (1,), dtype=jnp.float32)

    # Small tutorial-style input: 8 samples x 1 feature (pad-fallback, single block).
    x_small = jax.random.normal(k_x1, (8, 1), dtype=jnp.float32)
    y_small = jax.block_until_ready(linear_regression_forward(x_small, w, b))
    assert y_small.shape == x_small.shape
    assert jnp.allclose(y_small, w[0] * x_small + b[0], atol=1e-6), "mismatch (small)"

    # Medium input divisible by 1024: zero-pad path, single block.
    x_med = jax.random.normal(k_x3, (64, 512), dtype=jnp.float32)
    y_med = jax.block_until_ready(linear_regression_forward(x_med, w, b))
    assert y_med.shape == x_med.shape
    assert jnp.allclose(y_med, w[0] * x_med + b[0], atol=1e-6), "mismatch (med)"

    # Larger input (1.2M elems, divisible by 128 but not 256): zero-pad path,
    # multi-block pipelined grid with a ragged (masked) last block.
    x_big = jax.random.normal(k_x2, (3000, 400), dtype=jnp.float32)
    y_big = jax.block_until_ready(linear_regression_forward(x_big, w, b))
    assert y_big.shape == x_big.shape
    assert jnp.allclose(y_big, w[0] * x_big + b[0], atol=1e-6), "mismatch (big)"

    print("KERNEL_OK")
</pallas_src>

<mosaic_0001>
module attributes {stable_mosaic.version = 11 : i64} {
  func.func @_linreg_kernel(%arg0: i32, %arg1: memref<1xf32, #tpu.memory_space<smem>>, %arg2: memref<1xf32, #tpu.memory_space<smem>>, %arg3: memref<1x128xf32, #tpu.memory_space<vmem>>, %arg4: memref<1x128xf32, #tpu.memory_space<vmem>>) attributes {dimension_semantics = [#tpu.dimension_semantics<parallel>], iteration_bounds = array<i64: 1>, scalar_prefetch = 0 : i64, scratch_operands = 0 : i64, tpu.core_type = #tpu.core_type<tc>, window_params = [{transform_indices = @transform_0, window_bounds = array<i64: 1>}, {transform_indices = @transform_1, window_bounds = array<i64: 1>}, {transform_indices = @transform_2, window_bounds = array<i64: 1, 128>}, {transform_indices = @transform_3, window_bounds = array<i64: 1, 128>}]} {
    %c0 = arith.constant 0 : index
    %0 = memref.load %arg1[%c0] : memref<1xf32, #tpu.memory_space<smem>>
    %c0_0 = arith.constant 0 : index
    %c0_1 = arith.constant 0 : index
    %1 = vector.load %arg3[%c0_0, %c0_1] : memref<1x128xf32, #tpu.memory_space<vmem>>, vector<1x128xf32>
    %2 = vector.broadcast %0 : f32 to vector<1x128xf32>
    %3 = arith.mulf %2, %1 : vector<1x128xf32>
    %c0_2 = arith.constant 0 : index
    %4 = memref.load %arg2[%c0_2] : memref<1xf32, #tpu.memory_space<smem>>
    %5 = vector.broadcast %4 : f32 to vector<1x128xf32>
    %6 = arith.addf %3, %5 : vector<1x128xf32>
    %c0_3 = arith.constant 0 : index
    %c0_4 = arith.constant 0 : index
    %7 = vector.load %arg4[%c0_3, %c0_4] : memref<1x128xf32, #tpu.memory_space<vmem>>, vector<1x128xf32>
    tpu.vector_store %arg4[%c0_3, %c0_4], %6 {strides = array<i32>} : memref<1x128xf32, #tpu.memory_space<vmem>>, vector<1x128xf32>,
    return
  }
  func.func @transform_0(%arg0: i32) -> i32 {
    %c0_i32 = arith.constant 0 : i32
    %c0_i32_0 = arith.constant 0 : i32
    return %c0_i32 : i32
  }
  func.func @transform_1(%arg0: i32) -> i32 {
    %c0_i32 = arith.constant 0 : i32
    %c0_i32_0 = arith.constant 0 : i32
    return %c0_i32 : i32
  }
  func.func @transform_2(%arg0: i32) -> (i32, i32) {
    %c0_i32 = arith.constant 0 : i32
    %c0_i32_0 = arith.constant 0 : i32
    return %arg0, %c0_i32 : i32, i32
  }
  func.func @transform_3(%arg0: i32) -> (i32, i32) {
    %c0_i32 = arith.constant 0 : i32
    %c0_i32_0 = arith.constant 0 : i32
    return %arg0, %c0_i32 : i32, i32
  }
}

</mosaic_0001>

<bundles_post_ra>
// kernel: tpu_custom_call.1
= control target key start
LH: loop header
LB: loop body
LE: loop exit
PB: predicated region body
PF: predicated region fallthrough
CT: control target
= control target key end

     0   :  { %s106_s0 = inlined_call_operand.<no memory space> [shape: f32[1], index: 0, kind: input, shape index: {}]   ;;  %s107_s1 = inlined_call_operand.<no memory space> [shape: f32[1], index: 1, kind: input, shape index: {}]   ;;  %s108_s2 = inlined_call_operand.vmem [shape: f32[1,128], index: 2, kind: input, shape index: {}]   ;;  %s109_s3 = inlined_call_operand.hbm [shape: f32[1,128], index: 3, kind: output, shape index: {}]  }
   0x1   :  { %v18_v0 = vld [vmem:[%s108_s2] sm:$0x1]  ;;  %v19_v1 = vstv %s106_s0  ;;  %v22_v2 = vstv %s107_s1 }
   0x2   :  { %10 = vsyncpa [#allocation5], 0  ;;  %v20_v3 = vmul.f32 %v19_v1, %v18_v0  ;;  %s64_s18 = smov [#allocation4]  }
   0x3   :  { %s31_s19 = sshll.u32 %s64_s18, 4  ;;  %s32_s19 = int_to_ptr.vmem [resolvable:$true] %s31_s19 }
   0x4   :  { %v23_v4 = vadd.f32 %v22_v2, %v20_v3  ;;  %s40_s20 = scalar_lea.vmem %s32_s19, 16  ;;  %s44_s21 = scalar_lea.vmem %s32_s19, 32 }
   0x5   :  { %p41_p0 = scmp.ne.s32.totalorder %s32_s19, %s40_s20  ;;  %p45_p1 = scmp.lt.s32.totalorder %s32_s19, %s32_s19 }
   0x6   :  { %24 = vst [vmem:[#allocation4] sm:$0x1] %v23_v4  ;;  %p46_p2 = scmp.lt.s32.totalorder %s44_s21, %s40_s20 }
   0x8   :  { %p47_p3 = por %p46_p2, %p45_p1 }
   0xa   :  { %p48_p4 = pnand %p47_p3, %p41_p0 }
   0xc   :  { %51 = shalt.err (!%p48_p4)
}
   0xd   :  { %s52_s22 = scalar_lea.hbm %s109_s3, 16 }
   0xe   :  { %p53_p5 = scmp.ne.s32.totalorder %s109_s3, %s52_s22  ;;  %p56_p6 = scmp.lt.u32.totalorder %s52_s22, %s109_s3 }
  0x10   :  { %p58_p7 = pnand %p56_p6, %p53_p5 }
  0x12   :  { %61 = shalt.err (!%p58_p7)
}
  0x13   :  { %34 = dma.vmem_to_hbm [thread:$0]  %s32_s19, 16, %s109_s3, [#allocation5]  }
  0x14   :  { %62 = dma.done.wait [#allocation5], 16  }
  0x15   :  { %63 = vsyncadd [#allocation5], 4294967280 }
  0x16   :  { %38 = vsyncpa [#allocation5], 1 }

</bundles_post_ra>
